<compile_context>
chip_gen: v5e
topology: v5e:2x2
jax: 0.10.0
libtpu: 0.0.40
codegen_flags: <defaults>
</compile_context>

<pallas_src>
import math

import jax
import jax.numpy as jnp
from jax.experimental import pallas as pl
from jax.experimental.pallas import tpu as pltpu


def _make_kernel(B_r, tile_r, L, acc_rows, num_blocks, steps_per_core,
                 num_steps_total):
    """Builds the kernel body; all shape/grid info is closed over statically."""
    first_masked_blk = B_r // tile_r          # first block that is partial/phantom
    any_masked = first_masked_blk < num_steps_total
    groups = max(tile_r // 8, 1)

    def kernel(x_ref, t_ref, sum_ref, cnt_ref):
        c = pl.program_id(0)                  # core-split axis ("parallel")
        s = pl.program_id(1)                  # batch reduction axis ("arbitrary")

        # Zero this core's output accumulators on its first batch tile.
        @pl.when(s == 0)
        def _init():
            sum_ref[...] = jnp.zeros_like(sum_ref)
            cnt_ref[...] = jnp.zeros_like(cnt_ref)

        logical_blk = c * steps_per_core + s

        def accumulate(row_valid):
            x = x_ref[...].astype(jnp.float32)
            t = t_ref[...].astype(jnp.float32)
            # valid = ~isnan(target); jnp.where below never propagates NaN/Inf
            # from the deselected branch, so NaN targets / padded garbage rows
            # can never reach the accumulators.
            valid = jnp.logical_not(jnp.isnan(t))
            if row_valid is not None:
                valid = jnp.logical_and(valid, row_valid)
            diff = x - t
            loss = jnp.where(valid, diff * diff, 0.0)
            cnt = valid.astype(jnp.float32)
            if acc_rows == 8:
                # Reduce tile_r -> 8 sublanes with pure vreg-wise adds (no XLU).
                loss_p = loss.reshape(groups, 8, L).sum(axis=0)
                cnt_p = cnt.reshape(groups, 8, L).sum(axis=0)
            else:
                loss_p = loss.sum(axis=0, keepdims=True)
                cnt_p = cnt.sum(axis=0, keepdims=True)
            sum_ref[...] += loss_p
            cnt_ref[...] += cnt_p

        if not any_masked:
            accumulate(None)
        else:
            @pl.when(logical_blk < first_masked_blk)
            def _full_block():
                accumulate(None)

            @pl.when(logical_blk >= first_masked_blk)
            def _tail_block():
                # Partial last block (garbage-padded rows) or phantom block of
                # the core split: mask rows whose global index is past B_r.
                row = logical_blk * tile_r + jax.lax.broadcasted_iota(
                    jnp.int32, (tile_r, 1), 0)
                accumulate(row < B_r)

    return kernel


def mse_loss_pallas(inputs, targets, *, target_block_bytes=2 * 1024 * 1024,
                    tile_rows=None, use_both_cores=True):
    """Masked MSE loss (scalar), lane-dense batch-gridded Pallas TPU kernel."""
    assert inputs.shape == targets.shape and inputs.ndim == 2
    B, J = inputs.shape
    itemsize = jnp.dtype(inputs.dtype).itemsize

    # --- lane densification: (B, J) -> (B/k, k*J) with k*J % 128 == 0 ---------
    k = 128 // math.gcd(J, 128)
    if k > 1 and (B < k or B % k != 0):
        k = 1                         # lane-sparse fallback (see TODO in header)
    L = k * J
    B_r = B // k
    x2 = inputs.reshape(B_r, L)       # pure metadata: rows are already contiguous
    t2 = targets.reshape(B_r, L)

    # --- tile sizing: ~2 MiB per input block, VMEM-budget capped --------------
    bytes_per_row = L * itemsize
    max_block_bytes = 4 * 1024 * 1024        # 2 inputs x 2 bufs x 4 MiB = 16 MiB
    cap_rows = max(1, max_block_bytes // bytes_per_row)
    if tile_rows is None:
        tile_r = max(1, min(target_block_bytes, max_block_bytes) // bytes_per_row)
    else:
        tile_r = int(tile_rows)
    tile_r = int(min(tile_r, B_r, cap_rows))
    tile_r = max(tile_r, 1)
    if tile_r < B_r:
        # Second-to-last block dim must be a multiple of 8 unless it spans B_r.
        tile_r = min(max(8, (tile_r // 8) * 8), B_r)

    num_blocks = (B_r + tile_r - 1) // tile_r
    NC = 2 if (use_both_cores and num_blocks >= 2) else 1
    steps_per_core = (num_blocks + NC - 1) // NC
    acc_rows = 8 if tile_r % 8 == 0 else 1

    kernel = _make_kernel(B_r, tile_r, L, acc_rows, num_blocks, steps_per_core,
                          NC * steps_per_core)

    def in_map(c, s):
        # Clamp phantom blocks of the core split onto the last real block; their
        # rows are fully masked inside the kernel so they contribute nothing.
        return (jnp.minimum(c * steps_per_core + s, num_blocks - 1), 0)

    out_struct = jax.ShapeDtypeStruct((NC, acc_rows, L), jnp.float32)

    sums, cnts = pl.pallas_call(
        kernel,
        out_shape=(out_struct, out_struct),
        grid=(NC, steps_per_core),
        in_specs=[
            pl.BlockSpec((tile_r, L), in_map),
            pl.BlockSpec((tile_r, L), in_map),
        ],
        out_specs=(
            pl.BlockSpec((None, acc_rows, L), lambda c, s: (c, 0, 0)),
            pl.BlockSpec((None, acc_rows, L), lambda c, s: (c, 0, 0)),
        ),
        compiler_params=pltpu.CompilerParams(
            # Core-split axis is parallel (megacore on v7x); batch axis is a
            # sequential reduction into the per-core resident output blocks.
            dimension_semantics=("parallel", "arbitrary"),
        ),
    )(x2, t2)

    # Tiny epilogue (XLA): fold 2 cores x 8 sublanes x k joint groups, then the
    # exact per-joint divide and the mean over joints.
    per_joint_sum = sums.sum(axis=(0, 1)).reshape(k, J).sum(axis=0)
    per_joint_cnt = cnts.sum(axis=(0, 1)).reshape(k, J).sum(axis=0)
    # All-NaN joint column -> 0/0 = NaN, matching the PyTorch reference.
    return jnp.mean(per_joint_sum / per_joint_cnt)


def mse_loss_ref(inputs, targets):
    """Pure-JAX reference for validation."""
    nan_mask = jnp.isnan(targets)
    t_safe = jnp.where(nan_mask, 0.0, targets)
    loss = jnp.where(nan_mask, 0.0, (inputs - t_safe) ** 2)
    count = jnp.sum(jnp.where(nan_mask, 0.0, 1.0), axis=0)
    mean_per_joint = jnp.sum(loss, axis=0) / count
    return jnp.mean(mean_per_joint)


if __name__ == "__main__":
    key = jax.random.PRNGKey(0)
    ks = jax.random.split(key, 6)

    def check(inputs, targets, rtol=1e-5, **kw):
        out = jax.block_until_ready(mse_loss_pallas(inputs, targets, **kw))
        ref = mse_loss_ref(inputs, targets)
        assert jnp.isfinite(out), out
        assert jnp.allclose(out, ref, rtol=rtol, atol=1e-6), (float(out), float(ref))

    # --- case 1: tiny regression-target matrix (densified (2,128), 1 block) ---
    B, J = 8, 32
    x = jax.random.normal(ks[0], (B, J), dtype=jnp.float32)
    t = jax.random.normal(ks[1], (B, J), dtype=jnp.float32)
    t = (t.at[0, 3].set(jnp.nan).at[2, 7].set(jnp.nan)
          .at[5, 3].set(jnp.nan).at[6, 20].set(jnp.nan))
    check(x, t)

    # --- case 2: batch grid + 2-core split + partial last tile + phantom tile -
    # (544, 32) -> densified (136, 128); tile 32 rows -> 5 blocks (4 full + 1
    # partial), split 3/3 across the core axis (one phantom, fully masked).
    B2, J2 = 544, 32
    x2 = jax.random.normal(ks[2], (B2, J2), dtype=jnp.float32)
    t2 = jax.random.normal(ks[3], (B2, J2), dtype=jnp.float32)
    t2 = (t2.at[1, 0].set(jnp.nan).at[250, 31].set(jnp.nan)
            .at[540, 5].set(jnp.nan).at[543, 5].set(jnp.nan))
    check(x2, t2, rtol=5e-5, tile_rows=32)

    # --- case 3: non-densifiable J (k=1 fallback), phantom-block masking only --
    B3, J3 = 24, 33
    x3 = jax.random.normal(ks[4], (B3, J3), dtype=jnp.float32)
    t3 = jax.random.normal(ks[5], (B3, J3), dtype=jnp.float32)
    t3 = t3.at[0, 0].set(jnp.nan).at[23, 32].set(jnp.nan).at[11, 16].set(jnp.nan)
    check(x3, t3, tile_rows=8)

    print("KERNEL_OK")
</pallas_src>

<mosaic_0001>
module attributes {stable_mosaic.version = 11 : i64} {
  func.func @kernel(%arg0: i32, %arg1: i32, %arg2: memref<2x128xf32, #tpu.memory_space<vmem>>, %arg3: memref<2x128xf32, #tpu.memory_space<vmem>>, %arg4: memref<1x1x128xf32, #tpu.memory_space<vmem>>, %arg5: memref<1x1x128xf32, #tpu.memory_space<vmem>>) attributes {dimension_semantics = [#tpu.dimension_semantics<parallel>, #tpu.dimension_semantics<arbitrary>], iteration_bounds = array<i64: 1, 1>, scalar_prefetch = 0 : i64, scratch_operands = 0 : i64, tpu.core_type = #tpu.core_type<tc>, window_params = [{transform_indices = @transform_0, window_bounds = array<i64: 2, 128>}, {transform_indices = @transform_1, window_bounds = array<i64: 2, 128>}, {transform_indices = @transform_2, window_bounds = array<i64: 1, 1, 128>}, {transform_indices = @transform_3, window_bounds = array<i64: 1, 1, 128>}]} {
    %c0_i32 = arith.constant 0 : i32
    %0 = arith.cmpi eq, %arg1, %c0_i32 : i32
    %1 = arith.extui %0 : i1 to i32
    %c0_i32_0 = arith.constant 0 : i32
    %2 = arith.cmpi ne, %1, %c0_i32_0 : i32
    scf.if %2 {
      %cst_19 = arith.constant 0.000000e+00 : f32
      %29 = vector.broadcast %cst_19 : f32 to vector<1x128xf32>
      %c0_20 = arith.constant 0 : index
      %c0_21 = arith.constant 0 : index
      %c0_22 = arith.constant 0 : index
      %30 = vector.load %arg4[%c0_20, %c0_21, %c0_22] : memref<1x1x128xf32, #tpu.memory_space<vmem>>, vector<1x1x128xf32>
      %31 = vector.shape_cast %30 : vector<1x1x128xf32> to vector<1x128xf32>
      %32 = vector.shape_cast %29 : vector<1x128xf32> to vector<1x1x128xf32>
      tpu.vector_store %arg4[%c0_20, %c0_21, %c0_22], %32 {strides = array<i32>} : memref<1x1x128xf32, #tpu.memory_space<vmem>>, vector<1x1x128xf32>,
      %cst_23 = arith.constant 0.000000e+00 : f32
      %33 = vector.broadcast %cst_23 : f32 to vector<1x128xf32>
      %c0_24 = arith.constant 0 : index
      %c0_25 = arith.constant 0 : index
      %c0_26 = arith.constant 0 : index
      %34 = vector.load %arg5[%c0_24, %c0_25, %c0_26] : memref<1x1x128xf32, #tpu.memory_space<vmem>>, vector<1x1x128xf32>
      %35 = vector.shape_cast %34 : vector<1x1x128xf32> to vector<1x128xf32>
      %36 = vector.shape_cast %33 : vector<1x128xf32> to vector<1x1x128xf32>
      tpu.vector_store %arg5[%c0_24, %c0_25, %c0_26], %36 {strides = array<i32>} : memref<1x1x128xf32, #tpu.memory_space<vmem>>, vector<1x1x128xf32>,
    } else {
    }
    %c0 = arith.constant 0 : index
    %c0_1 = arith.constant 0 : index
    %3 = vector.load %arg2[%c0, %c0_1] : memref<2x128xf32, #tpu.memory_space<vmem>>, vector<2x128xf32>
    %c0_2 = arith.constant 0 : index
    %c0_3 = arith.constant 0 : index
    %4 = vector.load %arg3[%c0_2, %c0_3] : memref<2x128xf32, #tpu.memory_space<vmem>>, vector<2x128xf32>
    %5 = arith.cmpf one, %4, %4 : vector<2x128xf32>
    %cst = arith.constant dense<true> : vector<2x128xi1>
    %6 = arith.xori %5, %cst : vector<2x128xi1>
    %7 = arith.subf %3, %4 : vector<2x128xf32>
    %8 = arith.mulf %7, %7 : vector<2x128xf32>
    %cst_4 = arith.constant 0.000000e+00 : f32
    %9 = vector.broadcast %cst_4 : f32 to vector<2x128xf32>
    %10 = arith.select %6, %8, %9 : vector<2x128xi1>, vector<2x128xf32>
    %11 = arith.extui %6 : vector<2x128xi1> to vector<2x128xi32>
    %12 = arith.sitofp %11 : vector<2x128xi32> to vector<2x128xf32>
    %cst_5 = arith.constant dense<0.000000e+00> : vector<128xf32>
    %13 = vector.multi_reduction <add>, %10, %cst_5 [0] : vector<2x128xf32> to vector<128xf32>
    %14 = vector.shape_cast %13 : vector<128xf32> to vector<1x128xf32>
    %cst_6 = arith.constant dense<0.000000e+00> : vector<128xf32>
    %15 = vector.multi_reduction <add>, %12, %cst_6 [0] : vector<2x128xf32> to vector<128xf32>
    %16 = vector.shape_cast %15 : vector<128xf32> to vector<1x128xf32>
    %c0_7 = arith.constant 0 : index
    %c0_8 = arith.constant 0 : index
    %c0_9 = arith.constant 0 : index
    %17 = vector.load %arg4[%c0_7, %c0_8, %c0_9] : memref<1x1x128xf32, #tpu.memory_space<vmem>>, vector<1x1x128xf32>
    %18 = vector.shape_cast %17 : vector<1x1x128xf32> to vector<1x128xf32>
    %19 = arith.addf %18, %14 : vector<1x128xf32>
    %c0_10 = arith.constant 0 : index
    %c0_11 = arith.constant 0 : index
    %c0_12 = arith.constant 0 : index
    %20 = vector.load %arg4[%c0_10, %c0_11, %c0_12] : memref<1x1x128xf32, #tpu.memory_space<vmem>>, vector<1x1x128xf32>
    %21 = vector.shape_cast %20 : vector<1x1x128xf32> to vector<1x128xf32>
    %22 = vector.shape_cast %19 : vector<1x128xf32> to vector<1x1x128xf32>
    tpu.vector_store %arg4[%c0_10, %c0_11, %c0_12], %22 {strides = array<i32>} : memref<1x1x128xf32, #tpu.memory_space<vmem>>, vector<1x1x128xf32>,
    %c0_13 = arith.constant 0 : index
    %c0_14 = arith.constant 0 : index
    %c0_15 = arith.constant 0 : index
    %23 = vector.load %arg5[%c0_13, %c0_14, %c0_15] : memref<1x1x128xf32, #tpu.memory_space<vmem>>, vector<1x1x128xf32>
    %24 = vector.shape_cast %23 : vector<1x1x128xf32> to vector<1x128xf32>
    %25 = arith.addf %24, %16 : vector<1x128xf32>
    %c0_16 = arith.constant 0 : index
    %c0_17 = arith.constant 0 : index
    %c0_18 = arith.constant 0 : index
    %26 = vector.load %arg5[%c0_16, %c0_17, %c0_18] : memref<1x1x128xf32, #tpu.memory_space<vmem>>, vector<1x1x128xf32>
    %27 = vector.shape_cast %26 : vector<1x1x128xf32> to vector<1x128xf32>
    %28 = vector.shape_cast %25 : vector<1x128xf32> to vector<1x1x128xf32>
    tpu.vector_store %arg5[%c0_16, %c0_17, %c0_18], %28 {strides = array<i32>} : memref<1x1x128xf32, #tpu.memory_space<vmem>>, vector<1x1x128xf32>,
    return
  }
  func.func @transform_0(%arg0: i32, %arg1: i32) -> (i32, i32) {
    %c1_i32 = arith.constant 1 : i32
    %0 = arith.muli %arg0, %c1_i32 : i32
    %1 = arith.addi %0, %arg1 : i32
    %c0_i32 = arith.constant 0 : i32
    %2 = arith.minsi %1, %c0_i32 : i32
    %c0_i32_0 = arith.constant 0 : i32
    %c0_i32_1 = arith.constant 0 : i32
    return %2, %c0_i32_0 : i32, i32
  }
  func.func @transform_1(%arg0: i32, %arg1: i32) -> (i32, i32) {
    %c1_i32 = arith.constant 1 : i32
    %0 = arith.muli %arg0, %c1_i32 : i32
    %1 = arith.addi %0, %arg1 : i32
    %c0_i32 = arith.constant 0 : i32
    %2 = arith.minsi %1, %c0_i32 : i32
    %c0_i32_0 = arith.constant 0 : i32
    %c0_i32_1 = arith.constant 0 : i32
    return %2, %c0_i32_0 : i32, i32
  }
  func.func @transform_2(%arg0: i32, %arg1: i32) -> (i32, i32, i32) {
    %c0_i32 = arith.constant 0 : i32
    %c0_i32_0 = arith.constant 0 : i32
    %c0_i32_1 = arith.constant 0 : i32
    return %arg0, %c0_i32, %c0_i32_0 : i32, i32, i32
  }
  func.func @transform_3(%arg0: i32, %arg1: i32) -> (i32, i32, i32) {
    %c0_i32 = arith.constant 0 : i32
    %c0_i32_0 = arith.constant 0 : i32
    %c0_i32_1 = arith.constant 0 : i32
    return %arg0, %c0_i32, %c0_i32_0 : i32, i32, i32
  }
}

</mosaic_0001>

<bundles_post_ra>
// kernel: tpu_custom_call.1
= control target key start
LH: loop header
LB: loop body
LE: loop exit
PB: predicated region body
PF: predicated region fallthrough
CT: control target
= control target key end

     0   :  { %9 = vsyncpa [#allocation3], 0  ;;  %s282_s0 = inlined_call_operand.hbm [shape: f32[2,128], index: 0, kind: input, shape index: {}]   ;;  %s283_s1 = inlined_call_operand.hbm [shape: f32[2,128], index: 1, kind: input, shape index: {}]   ;;  %s284_s2 = inlined_call_operand.hbm [shape: f32[1,1,128], index: 2, kind: output, shape index: {0}]   ;;  %s285_s3 = inlined_call_operand.hbm [shape: f32[1,1,128], index: 3, kind: output, shape index: {1}]  }
   0x1   :  { %10 = vsyncpa [#allocation6], 0 }
   0x2   :  { %11 = vsyncpa [#allocation4], 0 }
   0x3   :  { %12 = vsyncpa [#allocation9], 0  ;;  %s23_s14 = sshll.u32 %s282_s0, 4  ;;  %s244_s15 = smov [#allocation2]   ;;  %s24_s14 = int_to_ptr.hbm [resolvable:$true] %s23_s14 }
   0x4   :  { %s25_s16 = sshll.u32 %s244_s15, 4  ;;  %s39_s19 = sshll.u32 %s283_s1, 4  ;;  %s26_s16 = int_to_ptr.vmem [resolvable:$true] %s25_s16  ;;  %s40_s19 = int_to_ptr.hbm [resolvable:$true] %s39_s19 }
   0x5   :  { %28 = dma.hbm_to_vmem [thread:$0]  %s24_s14, 32, %s26_s16, [#allocation3]  }
   0x6   :  { %s245_s20 = smov [#allocation5]  }
   0x7   :  { %s41_s21 = sshll.u32 %s245_s20, 4  ;;  %s42_s21 = int_to_ptr.vmem [resolvable:$true] %s41_s21 }
   0x8   :  { %44 = dma.hbm_to_vmem [thread:$0]  %s40_s19, 32, %s42_s21, [#allocation6]  }
   0x9   :  { %236 = dma.done.wait [#allocation3], 32  }
   0xa   :  { %237 = vsyncadd [#allocation3], 4294967264 }
   0xb   :  { %238 = dma.done.wait [#allocation6], 32  }
   0xc   :  { %239 = vsyncadd [#allocation6], 4294967264  ;;  %v246_v0 = vmov 0.0   ;;  %v65_v1 = vld [vmem:[#allocation2] sm:$0x3]  ;;  %vm74_vm1 = vcmask 1041408  }
   0xd   :  { %63 = vst [vmem:[#allocation7] sm:$0x1] %v246_v0  ;;  %v66_v2 = vld [vmem:[#allocation5] sm:$0x3]  ;;  %vm247_vm2 = vmmov 1   ;;  %s248_s0 = smov [#allocation8]  }
   0xe   :  { %64 = vst [vmem:[#allocation8] sm:$0x1] %v246_v0  ;;  %vm67_vm0 = vcmp.ne.f32.partialorder %v66_v2, %v66_v2  ;;  %v69_v3 = vsub.f32 %v65_v1, %v66_v2  ;;  %s111_s1 = sshll.u32 %s248_s0, 4  ;;  %s113_s24 = sshll.u32 %s285_s3, 4  ;;  %s112_s1 = int_to_ptr.vmem [resolvable:$true] %s111_s1  ;;  %s114_s24 = int_to_ptr.hbm [resolvable:$true] %s113_s24 }
   0xf   :  { %vm68_vm3 = vmxor %vm67_vm0, %vm247_vm2  ;;  %s249_s25 = smov [#allocation7]   ;;  %s102_s29 = sshll.u32 %s284_s2, 4  ;;  %s103_s29 = int_to_ptr.hbm [resolvable:$true] %s102_s29 }
  0x10   :  { %v70_v4 = vmul.f32 %v69_v3, %v69_v3  ;;  %v133_v5 = vsel %vm68_vm3, 1.0, %v246_v0  ;;  %s100_s26 = sshll.u32 %s249_s25, 4  ;;  %s101_s26 = int_to_ptr.vmem [resolvable:$true] %s100_s26 }
  0x11   :  { %v82_v6 = vsel %vm74_vm1, %v133_v5, 0.0 }
  0x12   :  { %v71_v7 = vsel %vm68_vm3, %v70_v4, 0.0  ;;  %v83_v8 = vrot.slane %v82_v6, 4 }
  0x13   :  { %v75_v9 = vsel %vm74_vm1, %v71_v7, 0.0 }
  0x14   :  { %v76_v10 = vrot.slane %v75_v9, 4  ;;  %v84_v11 = vadd.f32 %v83_v8, %v82_v6  ;;  %v89_v21 = vld [vmem:[#allocation7] sm:$0x1] }
  0x15   :  { %v92_v18 = vld [vmem:[#allocation8] sm:$0x1] }
  0x16   :  { %v77_v12 = vadd.f32 %v76_v10, %v75_v9  ;;  %v85_v13 = vrot.slane %v84_v11, 2 }
  0x18   :  { %v78_v14 = vrot.slane %v77_v12, 2  ;;  %v86_v15 = vadd.f32 %v85_v13, %v84_v11 }
  0x1a   :  { %v79_v16 = vadd.f32 %v78_v14, %v77_v12  ;;  %v87_v17 = vrot.slane %v86_v15, 1 }
  0x1c   :  { %v80_v19 = vrot.slane %v79_v16, 1  ;;  %v88_v20 = vadd.f32 %v87_v17, %v86_v15 }
  0x1e   :  { %v81_v22 = vadd.f32 %v80_v19, %v79_v16  ;;  %v93_v23 = vadd.f32 %v92_v18, %v88_v20 }
  0x20   :  { %v90_v24 = vadd.f32 %v89_v21, %v81_v22  ;;  %94 = vst [vmem:[#allocation8] sm:$0x1] %v93_v23 }
  0x21   :  { %116 = dma.vmem_to_hbm [thread:$0]  %s112_s1, 16, %s114_s24, [#allocation9]  }
  0x22   :  { %91 = vst [vmem:[#allocation7] sm:$0x1] %v90_v24 }
  0x23   :  { %105 = dma.vmem_to_hbm [thread:$0]  %s101_s26, 16, %s103_s29, [#allocation4]  }
  0x24   :  { %240 = dma.done.wait [#allocation4], 16  }
  0x25   :  { %241 = vsyncadd [#allocation4], 4294967280 }
  0x26   :  { %242 = dma.done.wait [#allocation9], 16  }
  0x27   :  { %243 = vsyncadd [#allocation9], 4294967280 }
  0x28   :  { %125 = vsyncpa [#allocation3], 1 }
  0x29   :  { %126 = vsyncpa [#allocation6], 1 }
  0x2a   :  { %127 = vsyncpa [#allocation4], 1 }
  0x2b   :  { %128 = vsyncpa [#allocation9], 1 }

</bundles_post_ra>
